<compile_context>
chip_gen: v6e
topology: v6e:2x2x1
jax: 0.10.0
libtpu: 0.0.40
codegen_flags: <defaults>
</compile_context>

<pallas_src>
import functools

import jax
import jax.numpy as jnp
from jax.experimental import pallas as pl
from jax.experimental.pallas import tpu as pltpu

_INV_SQRT2 = 0.7071067811865476  # 1/sqrt(2), for exact (erf) GELU


def _round_up(n, m):
    return ((n + m - 1) // m) * m


def _cdiv(a, b):
    return -(-a // b)


@functools.lru_cache(maxsize=1)
def _vmem_capacity_bytes():
    """Per-generation VMEM capacity; conservative 64 MiB (v7x per-TC) fallback."""
    try:
        info = pltpu.get_tpu_info()
        cap = getattr(info, "vmem_capacity_bytes", None)
        if cap:
            return int(cap)
    except Exception:
        pass
    return 64 * 1024 * 1024


def _mlp_block_kernel(x_ref, w1_ref, b1_ref, w2_ref, b2_ref, o_ref, acc_ref,
                      *, approximate_gelu):
    # x_ref: (tm, Dp)   w1_ref: (Dp, tk)  b1_ref: (1, tk)
    # w2_ref: (tk, Dp)  b2_ref: (1, Dp)   o_ref: (tm, Dp)  acc_ref: (tm, Dp) f32
    k = pl.program_id(1)

    @pl.when(k == 0)
    def _():
        acc_ref[...] = jnp.zeros_like(acc_ref)

    # Linear 1 on this H-chunk (MXU, f32 accumulation).
    h = jnp.dot(x_ref[...], w1_ref[...], preferred_element_type=jnp.float32)
    h = h + b1_ref[...].astype(jnp.float32)

    if approximate_gelu:
        # tanh approximation -> EUP slot (nearly free); deviates from torch default.
        h = jax.nn.gelu(h, approximate=True)
    else:
        # Exact erf GELU, matching torch.nn.GELU() (approximate='none').
        h = 0.5 * h * (1.0 + jax.lax.erf(h * _INV_SQRT2))

    # If weights are narrow (e.g. bf16), cast the activation down so the bf16
    # MXU path is used; accumulation stays f32.
    if w2_ref.dtype != jnp.float32:
        h = h.astype(w2_ref.dtype)

    acc_ref[...] += jnp.dot(h, w2_ref[...], preferred_element_type=jnp.float32)

    @pl.when(k == pl.num_programs(1) - 1)
    def _():
        o_ref[...] = (acc_ref[...] + b2_ref[...].astype(jnp.float32)).astype(o_ref.dtype)


@functools.partial(
    jax.jit, static_argnames=("tm", "tk", "approximate_gelu", "matmul_dtype"))
def mlp_block(x, w1, b1, w2, b2, *, tm=None, tk=512,
              approximate_gelu=False, matmul_dtype=None):
    """x: [..., D]; w1: [D, H]; b1: [H]; w2: [H, D]; b2: [D].

    matmul_dtype: e.g. jnp.bfloat16 to use the fast bf16 MXU path for f32 models.
    approximate_gelu: tanh GELU (EUP) instead of exact erf (torch default).
    """
    orig_shape = x.shape
    D = orig_shape[-1]
    H = w1.shape[-1]
    x2 = x.reshape(-1, D)
    M = x2.shape[0]

    vmem_cap = _vmem_capacity_bytes()

    # Lane-dense feature padding (multiples of 128); H additionally rounded to
    # a multiple of the hidden-chunk size so the grid divides evenly.
    D_pad = _round_up(D, 128)
    H_pad = _round_up(H, 128)
    tk_eff = min(tk, H_pad)
    H_pad = _round_up(H_pad, tk_eff)

    # Row tile: 512 on 128 MiB parts (v5e/v6e), 256 on 64 MiB parts (v7x).
    if tm is None:
        tm = 512 if vmem_cap >= 96 * 1024 * 1024 else 256
    tm = _round_up(tm, 8)
    tm_eff = min(tm, _round_up(M, 8))

    # Guarantee >= 2 grid steps on the parallel row axis when possible so both
    # v7x TensorCores get work (and the pipeline actually overlaps).
    while tm_eff > 8 and _cdiv(M, tm_eff) < 2:
        tm_eff = _round_up(tm_eff // 2, 8)

    x_isz = jnp.dtype(matmul_dtype or x.dtype).itemsize
    w_isz = jnp.dtype(matmul_dtype or w1.dtype).itemsize
    o_isz = jnp.dtype(x.dtype).itemsize

    def vmem_estimate(rows):
        return (
            2 * rows * D_pad * x_isz                           # x tile (double-buffered)
            + 2 * rows * D_pad * o_isz                         # out tile (double-buffered)
            + 2 * (D_pad * tk_eff + tk_eff * D_pad) * w_isz    # streamed W1/W2 chunks
            + 2 * (tk_eff + D_pad) * 4                         # bias chunks
            + rows * D_pad * 4                                 # f32 accumulator scratch
            + 2 * rows * tk_eff * 4                            # f32 GELU temporaries
        )

    budget = int(0.85 * vmem_cap)
    while tm_eff > 8 and vmem_estimate(tm_eff) > budget:
        tm_eff = _round_up(tm_eff // 2, 8)

    M_pad = _round_up(M, tm_eff)
    vmem_limit = int(min(max(int(1.2 * vmem_estimate(tm_eff)),
                             32 * 1024 * 1024), budget))

    cast = (lambda a: a.astype(matmul_dtype)) if matmul_dtype is not None else (lambda a: a)

    # Pad only when actually needed (avoid extra HBM passes over activations).
    x_p = cast(x2)
    if (M_pad, D_pad) != (M, D):
        x_p = jnp.pad(x_p, ((0, M_pad - M), (0, D_pad - D)))
    w1_p = cast(w1)
    if (D_pad, H_pad) != (D, H):
        w1_p = jnp.pad(w1_p, ((0, D_pad - D), (0, H_pad - H)))
    w2_p = cast(w2)
    if (H_pad, D_pad) != (H, D):
        w2_p = jnp.pad(w2_p, ((0, H_pad - H), (0, D_pad - D)))
    b1_p = (b1 if H_pad == H else jnp.pad(b1, (0, H_pad - H))).reshape(1, H_pad)
    b2_p = (b2 if D_pad == D else jnp.pad(b2, (0, D_pad - D))).reshape(1, D_pad)

    kernel = functools.partial(_mlp_block_kernel, approximate_gelu=approximate_gelu)

    out = pl.pallas_call(
        kernel,
        out_shape=jax.ShapeDtypeStruct((M_pad, D_pad), x.dtype),
        grid_spec=pltpu.PrefetchScalarGridSpec(
            num_scalar_prefetch=0,
            grid=(M_pad // tm_eff, H_pad // tk_eff),
            in_specs=[
                pl.BlockSpec((tm_eff, D_pad), lambda i, k: (i, 0)),   # x row tile (k-invariant)
                pl.BlockSpec((D_pad, tk_eff), lambda i, k: (0, k)),   # W1 H-chunk (streamed)
                pl.BlockSpec((1, tk_eff), lambda i, k: (0, k)),       # b1 H-chunk
                pl.BlockSpec((tk_eff, D_pad), lambda i, k: (k, 0)),   # W2 H-chunk (streamed)
                pl.BlockSpec((1, D_pad), lambda i, k: (0, 0)),        # b2 (constant)
            ],
            out_specs=pl.BlockSpec((tm_eff, D_pad), lambda i, k: (i, 0)),
            scratch_shapes=[pltpu.VMEM((tm_eff, D_pad), jnp.float32)],
        ),
        compiler_params=pltpu.CompilerParams(
            dimension_semantics=("parallel", "arbitrary"),
            vmem_limit_bytes=vmem_limit,
        ),
    )(x_p, w1_p, b1_p, w2_p, b2_p)

    if (M_pad, D_pad) != (M, D):
        out = out[:M, :D]
    return out.reshape(orig_shape)


def _reference_mlp_block(x, w1, b1, w2, b2):
    hp = jax.lax.Precision.HIGHEST
    h = jnp.einsum("...d,dh->...h", x, w1, precision=hp) + b1
    h = 0.5 * h * (1.0 + jax.lax.erf(h * _INV_SQRT2))
    return jnp.einsum("...h,hd->...d", h, w2, precision=hp) + b2


def _make_params(key, D, H, dtype=jnp.float32):
    kw1, kb1, kw2, kb2 = jax.random.split(key, 4)
    lim1 = 1.0 / jnp.sqrt(D)
    lim2 = 1.0 / jnp.sqrt(H)
    w1 = jax.random.uniform(kw1, (D, H), minval=-lim1, maxval=lim1, dtype=dtype)
    b1 = jax.random.uniform(kb1, (H,), minval=-lim1, maxval=lim1, dtype=dtype)
    w2 = jax.random.uniform(kw2, (H, D), minval=-lim2, maxval=lim2, dtype=dtype)
    b2 = jax.random.uniform(kb2, (D,), minval=-lim2, maxval=lim2, dtype=dtype)
    return w1, b1, w2, b2


if __name__ == "__main__":
    key = jax.random.PRNGKey(0)

    # --- Small shapes matching the module defaults: batch=2, seq=8, D=32, H=64.
    B, S, D, H = 2, 8, 32, 64
    kx, kp = jax.random.split(key)
    x = jax.random.normal(kx, (B, S, D), dtype=jnp.float32)
    w1, b1, w2, b2 = _make_params(kp, D, H)

    out = jax.block_until_ready(mlp_block(x, w1, b1, w2, b2))
    ref = _reference_mlp_block(x, w1, b1, w2, b2)
    assert out.shape == x.shape
    assert jnp.allclose(out, ref, atol=1e-5, rtol=1e-5), "small-shape mismatch vs reference"

    # --- Lane-aligned shapes (no activation padding) exercising multi-step row
    #     grid and multi-chunk hidden reduction (tk=256 -> 2 H-chunks).
    B2, S2, D2, H2 = 4, 128, 256, 512
    kx2, kp2 = jax.random.split(jax.random.PRNGKey(1))
    x2 = jax.random.normal(kx2, (B2, S2, D2), dtype=jnp.float32)
    w1b, b1b, w2b, b2b = _make_params(kp2, D2, H2)

    out2 = jax.block_until_ready(mlp_block(x2, w1b, b1b, w2b, b2b, tk=256))
    ref2 = _reference_mlp_block(x2, w1b, b1b, w2b, b2b)
    assert out2.shape == x2.shape
    assert jnp.allclose(out2, ref2, atol=2e-3, rtol=2e-3), "large-shape mismatch vs reference"

    # --- Fast-path smoke test: bf16 MXU matmuls + tanh GELU (loose tolerance).
    out3 = jax.block_until_ready(
        mlp_block(x2, w1b, b1b, w2b, b2b, tk=256,
                  matmul_dtype=jnp.bfloat16, approximate_gelu=True))
    assert out3.shape == x2.shape
    assert jnp.allclose(out3, ref2, atol=5e-2, rtol=5e-2), "bf16 fast-path mismatch"

    print("KERNEL_OK")
</pallas_src>

<mosaic_0001>
module attributes {stable_mosaic.version = 11 : i64} {
  func.func @_mlp_block_kernel(%arg0: i32, %arg1: i32, %arg2: memref<8x128xf32, #tpu.memory_space<vmem>>, %arg3: memref<128x128xf32, #tpu.memory_space<vmem>>, %arg4: memref<1x128xf32, #tpu.memory_space<vmem>>, %arg5: memref<128x128xf32, #tpu.memory_space<vmem>>, %arg6: memref<1x128xf32, #tpu.memory_space<vmem>>, %arg7: memref<8x128xf32, #tpu.memory_space<vmem>>, %arg8: memref<8x128xf32, #tpu.memory_space<vmem>>) attributes {dimension_semantics = [#tpu.dimension_semantics<parallel>, #tpu.dimension_semantics<arbitrary>], iteration_bounds = array<i64: 2, 1>, scalar_prefetch = 0 : i64, scratch_operands = 1 : i64, tpu.core_type = #tpu.core_type<tc>, window_params = [{transform_indices = @transform_0, window_bounds = array<i64: 8, 128>}, {transform_indices = @transform_1, window_bounds = array<i64: 128, 128>}, {transform_indices = @transform_2, window_bounds = array<i64: 1, 128>}, {transform_indices = @transform_3, window_bounds = array<i64: 128, 128>}, {pipeline_mode = #tpu.pipeline_mode<synchronous>, transform_indices = @transform_4, window_bounds = array<i64: 1, 128>}, {transform_indices = @transform_5, window_bounds = array<i64: 8, 128>}]} {
    %c0_i32 = arith.constant 0 : i32
    %0 = arith.cmpi eq, %arg1, %c0_i32 : i32
    %1 = arith.extui %0 : i1 to i32
    %c0_i32_0 = arith.constant 0 : i32
    %2 = arith.cmpi ne, %1, %c0_i32_0 : i32
    scf.if %2 {
      %cst_18 = arith.constant 0.000000e+00 : f32
      %25 = vector.broadcast %cst_18 : f32 to vector<8x128xf32>
      %c0_19 = arith.constant 0 : index
      %c0_20 = arith.constant 0 : index
      %26 = vector.load %arg8[%c0_19, %c0_20] : memref<8x128xf32, #tpu.memory_space<vmem>>, vector<8x128xf32>
      tpu.vector_store %arg8[%c0_19, %c0_20], %25 {strides = array<i32>} : memref<8x128xf32, #tpu.memory_space<vmem>>, vector<8x128xf32>,
    } else {
    }
    %c0 = arith.constant 0 : index
    %c0_1 = arith.constant 0 : index
    %3 = vector.load %arg2[%c0, %c0_1] : memref<8x128xf32, #tpu.memory_space<vmem>>, vector<8x128xf32>
    %c0_2 = arith.constant 0 : index
    %c0_3 = arith.constant 0 : index
    %4 = vector.load %arg3[%c0_2, %c0_3] : memref<128x128xf32, #tpu.memory_space<vmem>>, vector<128x128xf32>
    %cst = arith.constant dense<0.000000e+00> : vector<8x128xf32>
    %5 = tpu.matmul %3, %4, %cst {dimension_numbers = #tpu.dot_dimension_numbers<[1], [0], [0], [1], [0, 0, 1, 1], [], []>} : vector<8x128xf32>, vector<128x128xf32>, vector<8x128xf32> -> vector<8x128xf32>
    %c0_4 = arith.constant 0 : index
    %c0_5 = arith.constant 0 : index
    %6 = vector.load %arg4[%c0_4, %c0_5] : memref<1x128xf32, #tpu.memory_space<vmem>>, vector<1x128xf32>
    %7 = vector.broadcast %6 : vector<1x128xf32> to vector<8x128xf32>
    %8 = arith.addf %5, %7 : vector<8x128xf32>
    %cst_6 = arith.constant 5.000000e-01 : f32
    %9 = vector.broadcast %cst_6 : f32 to vector<8x128xf32>
    %10 = arith.mulf %9, %8 : vector<8x128xf32>
    %cst_7 = arith.constant 0.707106769 : f32
    %11 = vector.broadcast %cst_7 : f32 to vector<8x128xf32>
    %12 = arith.mulf %8, %11 : vector<8x128xf32>
    %13 = math.erf %12 : vector<8x128xf32>
    %cst_8 = arith.constant 1.000000e+00 : f32
    %14 = vector.broadcast %cst_8 : f32 to vector<8x128xf32>
    %15 = arith.addf %14, %13 : vector<8x128xf32>
    %16 = arith.mulf %10, %15 : vector<8x128xf32>
    %c0_9 = arith.constant 0 : index
    %c0_10 = arith.constant 0 : index
    %17 = vector.load %arg8[%c0_9, %c0_10] : memref<8x128xf32, #tpu.memory_space<vmem>>, vector<8x128xf32>
    %c0_11 = arith.constant 0 : index
    %c0_12 = arith.constant 0 : index
    %18 = vector.load %arg5[%c0_11, %c0_12] : memref<128x128xf32, #tpu.memory_space<vmem>>, vector<128x128xf32>
    %cst_13 = arith.constant dense<0.000000e+00> : vector<8x128xf32>
    %19 = tpu.matmul %16, %18, %cst_13 {dimension_numbers = #tpu.dot_dimension_numbers<[1], [0], [0], [1], [0, 0, 1, 1], [], []>} : vector<8x128xf32>, vector<128x128xf32>, vector<8x128xf32> -> vector<8x128xf32>
    %20 = arith.addf %17, %19 : vector<8x128xf32>
    %c0_14 = arith.constant 0 : index
    %c0_15 = arith.constant 0 : index
    %21 = vector.load %arg8[%c0_14, %c0_15] : memref<8x128xf32, #tpu.memory_space<vmem>>, vector<8x128xf32>
    tpu.vector_store %arg8[%c0_14, %c0_15], %20 {strides = array<i32>} : memref<8x128xf32, #tpu.memory_space<vmem>>, vector<8x128xf32>,
    %c0_i32_16 = arith.constant 0 : i32
    %22 = arith.cmpi eq, %arg1, %c0_i32_16 : i32
    %23 = arith.extui %22 : i1 to i32
    %c0_i32_17 = arith.constant 0 : i32
    %24 = arith.cmpi ne, %23, %c0_i32_17 : i32
    scf.if %24 {
      %c0_18 = arith.constant 0 : index
      %c0_19 = arith.constant 0 : index
      %25 = vector.load %arg8[%c0_18, %c0_19] : memref<8x128xf32, #tpu.memory_space<vmem>>, vector<8x128xf32>
      %c0_20 = arith.constant 0 : index
      %c0_21 = arith.constant 0 : index
      %26 = vector.load %arg6[%c0_20, %c0_21] : memref<1x128xf32, #tpu.memory_space<vmem>>, vector<1x128xf32>
      %27 = vector.broadcast %26 : vector<1x128xf32> to vector<8x128xf32>
      %28 = arith.addf %25, %27 : vector<8x128xf32>
      %c0_22 = arith.constant 0 : index
      %c0_23 = arith.constant 0 : index
      %29 = vector.load %arg7[%c0_22, %c0_23] : memref<8x128xf32, #tpu.memory_space<vmem>>, vector<8x128xf32>
      tpu.vector_store %arg7[%c0_22, %c0_23], %28 {strides = array<i32>} : memref<8x128xf32, #tpu.memory_space<vmem>>, vector<8x128xf32>,
    } else {
    }
    return
  }
  func.func @transform_0(%arg0: i32, %arg1: i32) -> (i32, i32) {
    %c0_i32 = arith.constant 0 : i32
    %c0_i32_0 = arith.constant 0 : i32
    return %arg0, %c0_i32 : i32, i32
  }
  func.func @transform_1(%arg0: i32, %arg1: i32) -> (i32, i32) {
    %c0_i32 = arith.constant 0 : i32
    %c0_i32_0 = arith.constant 0 : i32
    return %c0_i32, %arg1 : i32, i32
  }
  func.func @transform_2(%arg0: i32, %arg1: i32) -> (i32, i32) {
    %c0_i32 = arith.constant 0 : i32
    %c0_i32_0 = arith.constant 0 : i32
    return %c0_i32, %arg1 : i32, i32
  }
  func.func @transform_3(%arg0: i32, %arg1: i32) -> (i32, i32) {
    %c0_i32 = arith.constant 0 : i32
    %c0_i32_0 = arith.constant 0 : i32
    return %arg1, %c0_i32 : i32, i32
  }
  func.func @transform_4(%arg0: i32, %arg1: i32) -> (i32, i32) {
    %c0_i32 = arith.constant 0 : i32
    %c0_i32_0 = arith.constant 0 : i32
    %c0_i32_1 = arith.constant 0 : i32
    return %c0_i32, %c0_i32_0 : i32, i32
  }
  func.func @transform_5(%arg0: i32, %arg1: i32) -> (i32, i32) {
    %c0_i32 = arith.constant 0 : i32
    %c0_i32_0 = arith.constant 0 : i32
    return %arg0, %c0_i32 : i32, i32
  }
}

</mosaic_0001>

<bundles_post_ra>
// kernel: mlp_block.1
= control target key start
LH: loop header
LB: loop body
LE: loop exit
PB: predicated region body
PF: predicated region fallthrough
CT: control target
= control target key end

     0   :  { %s797_s18 = smov 0   ;;  %s799_s19 = smov 0   ;;  %s977_s0 = inlined_call_operand.vmem [shape: f32[16,128], index: 0, kind: input, shape index: {}]   ;;  %s978_s1 = inlined_call_operand.vmem [shape: f32[128,128], index: 1, kind: input, shape index: {}]   ;;  %s979_s2 = inlined_call_operand.vmem [shape: f32[1,128], index: 2, kind: input, shape index: {}]   ;;  %s980_s3 = inlined_call_operand.vmem [shape: f32[128,128], index: 3, kind: input, shape index: {}]   ;;  %s981_s4 = inlined_call_operand.vmem [shape: f32[1,128], index: 4, kind: input, shape index: {}]   ;;  %s982_s5 = inlined_call_operand.vmem [shape: f32[16,128], index: 5, kind: output, shape index: {}]  }
   0x1   :  { %s801_s20 = smov 0  }
   0x2 LB: > { %s27_s21 = sadd.s32 1, %s759_s19  ;;  %p602_p0 = scmp.ge.s32.totalorder %s763_s20, 1  ;;  %s763_s20 = sphi %s801_s20, %s15_s20   ;;  %s759_s19 = sphi %s799_s19, %s984_s19   ;;  %s755_s18 = sphi %s797_s18, %s983_s18  }
   0x3   : > { %p29_p1 = scmp.ge.s32.totalorder %s27_s21, 2  ;;  %p226_p2 = scmp.lt.s32.totalorder %s763_s20, 3 }
   0x5   : > { %s986_s21 = smov (%p29_p1, %s27_s21), 0  ;;  %p227_p3 = pnand %p602_p0, %p226_p2 }
   0x6   : > { %p264_p4 = scmp.lt.s32.totalorder (!%p227_p3), %s755_s18, 1 }
   0x7   : > { %230 = sbr.rel (%p227_p3) target bundleno = 456 (0x1c8), region = 40 }
   0xc   : > { %v306_v0 = vld [vmem:[%s978_s1 + $0x78] sm:$0xff]  ;;  %v765_v1 = vmov 0.0   ;;  %v305_v2 = vld [vmem:[%s978_s1 + $0x70] sm:$0xff]  ;;  %vm766_vm0 = vmmov 0   ;;  %v304_v3 = vld [vmem:[%s978_s1 + $0x68] sm:$0xff]  ;;  %s988_s18 = smov (!%p264_p4, %s755_s18), 1 }
   0xd   : > { %643 = vmatprep.subr.mxu0 %v765_v1  ;;  %675 = vmatprep.mubr.msk.f32.mxu0 %vm766_vm0, %v765_v1  ;;  %v303_v4 = vld [vmem:[%s978_s1 + $0x60] sm:$0xff]  ;;  %v405_v5 = vld [vmem:[%s980_s3 + $0x78] sm:$0xff]  ;;  %v404_v6 = vld [vmem:[%s980_s3 + $0x70] sm:$0xff]  ;;  %s603_s10 = sshll.u32 %s988_s18, 3 }
   0xe   : > { %644 = vmatpush3.msra.mxu0 %v306_v0  ;;  %678 = vmatprep.subr.mxu1 %v765_v1  ;;  %v302_v7 = vld [vmem:[%s978_s1 + $0x58] sm:$0xff]  ;;  %v403_v8 = vld [vmem:[%s980_s3 + $0x68] sm:$0xff]  ;;  %v301_v9 = vld [vmem:[%s978_s1 + $0x50] sm:$0xff]  ;;  %s267_s17 = scalar_lea.vmem %s977_s0, %s603_s10  ;;  %s284_s9 = scalar_lea.vmem %s982_s5, %s603_s10 }
   0xf   : > { %645 = vmatprep.subr.mxu0 %v765_v1  ;;  %710 = vmatprep.mubr.msk.f32.mxu1 %vm766_vm0, %v765_v1  ;;  %v402_v10 = vld [vmem:[%s980_s3 + $0x60] sm:$0xff]  ;;  %v300_v11 = vld [vmem:[%s978_s1 + $0x48] sm:$0xff]  ;;  %v298_v13 = vld [vmem:[%s978_s1 + $0x38] sm:$0xff] }
  0x10   : > { %646 = vmatpush3.msra.mxu0 %v305_v2  ;;  %679 = vmatpush3.msra.mxu1 %v405_v5  ;;  %v299_v12 = vld [vmem:[%s978_s1 + $0x40] sm:$0xff]  ;;  %v297_v14 = vld [vmem:[%s978_s1 + $0x30] sm:$0xff]  ;;  %v296_v15 = vld [vmem:[%s978_s1 + $0x28] sm:$0xff] }
  0x11   : > { %647 = vmatprep.subr.mxu0 %v765_v1  ;;  %680 = vmatprep.subr.mxu1 %v765_v1  ;;  %v295_v16 = vld [vmem:[%s978_s1 + $0x20] sm:$0xff]  ;;  %v294_v17 = vld [vmem:[%s978_s1 + $0x18] sm:$0xff]  ;;  %v293_v18 = vld [vmem:[%s978_s1 + $0x10] sm:$0xff] }
  0x12   : > { %648 = vmatpush3.msra.mxu0 %v304_v3  ;;  %681 = vmatpush3.msra.mxu1 %v404_v6  ;;  %v292_v19 = vld [vmem:[%s978_s1 + $0x8] sm:$0xff]  ;;  %v291_v20 = vld [vmem:[%s978_s1] sm:$0xff]  ;;  %v401_v22 = vld [vmem:[%s980_s3 + $0x58] sm:$0xff] }
  0x13   : > { %649 = vmatprep.subr.mxu0 %v765_v1  ;;  %682 = vmatprep.subr.mxu1 %v765_v1  ;;  %v290_v21 = vld [vmem:[%s267_s17] sm:$0xff]  ;;  %v400_v23 = vld [vmem:[%s980_s3 + $0x50] sm:$0xff]  ;;  %v399_v24 = vld [vmem:[%s980_s3 + $0x48] sm:$0xff] }
  0x14   : > { %650 = vmatpush3.msra.mxu0 %v303_v4  ;;  %683 = vmatpush3.msra.mxu1 %v403_v8  ;;  %v398_v25 = vld [vmem:[%s980_s3 + $0x40] sm:$0xff]  ;;  %v397_v26 = vld [vmem:[%s980_s3 + $0x38] sm:$0xff]  ;;  %v396_v27 = vld [vmem:[%s980_s3 + $0x30] sm:$0xff] }
  0x15   : > { %651 = vmatprep.subr.mxu0 %v765_v1  ;;  %684 = vmatprep.subr.mxu1 %v765_v1  ;;  %v395_v28 = vld [vmem:[%s980_s3 + $0x28] sm:$0xff]  ;;  %v394_v29 = vld [vmem:[%s980_s3 + $0x20] sm:$0xff]  ;;  %v393_v30 = vld [vmem:[%s980_s3 + $0x18] sm:$0xff] }
  0x16   : > { %652 = vmatpush3.msra.mxu0 %v302_v7  ;;  %685 = vmatpush3.msra.mxu1 %v402_v10  ;;  %v392_v31 = vld [vmem:[%s980_s3 + $0x10] sm:$0xff]  ;;  %v391_v32 = vld [vmem:[%s980_s3 + $0x8] sm:$0xff]  ;;  %v390_v33 = vld [vmem:[%s980_s3] sm:$0xff] }
  0x17   : > { %653 = vmatprep.subr.mxu0 %v765_v1  ;;  %686 = vmatprep.subr.mxu1 %v765_v1  ;;  %v605_v34 = vld [vmem:[%s979_s2] ss:$0 sm:$0xff] }
  0x18   : > { %654 = vmatpush3.msra.mxu0 %v301_v9  ;;  %687 = vmatpush3.msra.mxu1 %v401_v22  ;;  %v606_v43 = vld [vmem:[%s981_s4] ss:$0 sm:$0xff] }
  0x19   : > { %655 = vmatprep.subr.mxu0 %v765_v1  ;;  %688 = vmatprep.subr.mxu1 %v765_v1 }
  0x1a   : > { %656 = vmatpush3.msra.mxu0 %v300_v11  ;;  %689 = vmatpush3.msra.mxu1 %v400_v23 }
  0x1b   : > { %657 = vmatprep.subr.mxu0 %v765_v1  ;;  %690 = vmatprep.subr.mxu1 %v765_v1 }
  0x1c   : > { %658 = vmatpush3.msra.mxu0 %v299_v12  ;;  %691 = vmatpush3.msra.mxu1 %v399_v24 }
  0x1d   : > { %659 = vmatprep.subr.mxu0 %v765_v1  ;;  %692 = vmatprep.subr.mxu1 %v765_v1 }
  0x1e   : > { %660 = vmatpush3.msra.mxu0 %v298_v13  ;;  %693 = vmatpush3.msra.mxu1 %v398_v25 }
  0x1f   : > { %661 = vmatprep.subr.mxu0 %v765_v1  ;;  %694 = vmatprep.subr.mxu1 %v765_v1 }
  0x20   : > { %662 = vmatpush3.msra.mxu0 %v297_v14  ;;  %695 = vmatpush3.msra.mxu1 %v397_v26 }
  0x21   : > { %663 = vmatprep.subr.mxu0 %v765_v1  ;;  %696 = vmatprep.subr.mxu1 %v765_v1 }
  0x22   : > { %664 = vmatpush3.msra.mxu0 %v296_v15  ;;  %697 = vmatpush3.msra.mxu1 %v396_v27 }
  0x23   : > { %665 = vmatprep.subr.mxu0 %v765_v1  ;;  %698 = vmatprep.subr.mxu1 %v765_v1 }
  0x24   : > { %666 = vmatpush3.msra.mxu0 %v295_v16  ;;  %699 = vmatpush3.msra.mxu1 %v395_v28 }
  0x25   : > { %667 = vmatprep.subr.mxu0 %v765_v1  ;;  %700 = vmatprep.subr.mxu1 %v765_v1 }
  0x26   : > { %668 = vmatpush3.msra.mxu0 %v294_v17  ;;  %701 = vmatpush3.msra.mxu1 %v394_v29 }
  0x27   : > { %669 = vmatprep.subr.mxu0 %v765_v1  ;;  %702 = vmatprep.subr.mxu1 %v765_v1 }
  0x28   : > { %670 = vmatpush3.msra.mxu0 %v293_v18  ;;  %703 = vmatpush3.msra.mxu1 %v393_v30 }
  0x29   : > { %671 = vmatprep.subr.mxu0 %v765_v1  ;;  %704 = vmatprep.subr.mxu1 %v765_v1 }
  0x2a   : > { %672 = vmatpush3.msra.mxu0 %v292_v19  ;;  %705 = vmatpush3.msra.mxu1 %v392_v31 }
  0x2b   : > { %673 = vmatprep.subr.mxu0 %v765_v1  ;;  %706 = vmatprep.subr.mxu1 %v765_v1 }
  0x2c   : > { %674 = vmatpush3.msra.mxu0 %v291_v20  ;;  %707 = vmatpush3.msra.mxu1 %v391_v32 }
  0x2d   : > { %676 = vmatmul.mubr.f32.vlgmr.msra.gmra.mxu0 %v290_v21  ;;  %708 = vmatprep.subr.mxu1 %v765_v1 }
  0x2e   : > { %709 = vmatpush3.msra.mxu1 %v390_v33 }
  0xed   : > { %v380_v35 = vpop.f32.mrf.mxu0 }
  0xee   : > { %v381_v36 = vadd.f32 %v605_v34, %v380_v35 }
  0xef   : > { %v677_v37 = vpop.f32.mrf.mxu0 }
  0xf0   : > { %v385_v38 = vmul.f32 0.70710677, %v381_v36  ;;  %v384_v40 = vmul.f32 0.5, %v381_v36 }
  0xf2   : > { %739 = verf.f32 %v385_v38 }
  0xff   : > { %v740_v39 = vpop.eup %739 }
 0x100   : > { %v387_v41 = vadd.f32 1.0, %v740_v39 }
 0x102   : > { %v388_v42 = vmul.f32 %v387_v41, %v384_v40 }
 0x104   : > { %711 = vmatmul.mubr.f32.vlgmr.msra.gmra.mxu1 %v388_v42 }
 0x1c4   : > { %v472_v44 = vpop.f32.mrf.mxu1 }
 0x1c5   : > { %v489_v45 = vadd.f32 %v606_v43, %v472_v44 }
 0x1c6   : > { %v712_v46 = vpop.f32.mrf.mxu1 }
 0x1c7   : > { %490 = vst [vmem:[%s284_s9] sm:$0xff] %v489_v45 }
 0x1c8 PF: > { %s15_s20 = sadd.s32 1, %s763_s20   ;;  %s983_s18 = smov %s759_s19 }
 0x1c9   : > { %p12_p5 = scmp.ge.s32.totalorder %s15_s20, 4   ;;  %s984_s19 = smov %s986_s21 }
 0x1cb   :  { %14 = sbr.rel (!%p12_p5) target bundleno = 2 (0x2), region = 87 }

</bundles_post_ra>
